<compile_context>
chip_gen: v7x
topology: tpu7x:2x2x1
jax: 0.10.0
libtpu: 0.0.40
codegen_flags: <defaults>
</compile_context>

<pallas_src>
from typing import NamedTuple

import jax
import jax.numpy as jnp
from jax.experimental import pallas as pl
from jax.experimental.pallas import tpu as pltpu


_INV_SQRT2 = 0.7071067811865476
_SQRT_2_OVER_PI = 0.7978845608028654


def _gelu_f32(g, approximate):
    if approximate:
        # tanh approximation — transcendental goes to the EUP (free VLIW slot).
        return 0.5 * g * (1.0 + jnp.tanh(
            jnp.float32(_SQRT_2_OVER_PI) * (g + 0.044715 * g * g * g)))
    # Exact erf form, matching torch.nn.functional.gelu default.
    return 0.5 * g * (1.0 + jax.lax.erf(g * jnp.float32(_INV_SQRT2)))


# ----------------------------------------------------------------------------- kernels


def _make_single_k_kernel(tn, approximate):
    """Whole-K in one step: no k grid axis, no VMEM accumulator."""

    def kernel(x_ref, w_ref, b_ref, o_ref):
        # x_ref: (tm, Kp)   w_ref: (Kp, 2*tn)  [value | gate, per-tile interleaved]
        # b_ref: (1, 2*tn)  o_ref: (tm, tn)
        acc = jnp.dot(x_ref[...], w_ref[...], preferred_element_type=jnp.float32)
        acc = acc + b_ref[...].astype(jnp.float32)
        h = acc[:, :tn]          # 128-lane-aligned static split of the result
        g = acc[:, tn:]
        o_ref[...] = (h * _gelu_f32(g, approximate)).astype(o_ref.dtype)

    return kernel


def _make_multi_k_kernel(tn, approximate):
    """K reduction over the last grid axis with one merged (tm, 2*tn) accumulator."""

    def kernel(x_ref, w_ref, b_ref, o_ref, acc_ref):
        k = pl.program_id(2)
        part = jnp.dot(x_ref[...], w_ref[...], preferred_element_type=jnp.float32)

        @pl.when(k == 0)
        def _init():
            # Fold bias + first partial product into the init (no separate
            # broadcast store, one fewer accumulator load per output tile).
            acc_ref[...] = part + b_ref[...].astype(jnp.float32)

        @pl.when(k > 0)
        def _accum():
            acc_ref[...] += part

        @pl.when(k == pl.num_programs(2) - 1)
        def _finalize():
            acc = acc_ref[...]
            h = acc[:, :tn]
            g = acc[:, tn:]
            o_ref[...] = (h * _gelu_f32(g, approximate)).astype(o_ref.dtype)

    return kernel


# ----------------------------------------------------------------------------- helpers


def _round_up(x, m):
    return ((x + m - 1) // m) * m


def _pad2(a, rows, cols):
    r, c = a.shape
    if r == rows and c == cols:
        return a
    return jnp.pad(a, ((0, rows - r), (0, cols - c)))


def _pick_tile(total, requested, granule=128):
    """Largest multiple of `granule` <= requested that divides `total`
    (total is a multiple of granule) — avoids over-padding the weight."""
    total_g = total // granule
    req_g = max(1, requested // granule)
    for d in range(min(req_g, total_g), 0, -1):
        if total_g % d == 0:
            return d * granule
    return granule


class GegluParams(NamedTuple):
    w_merged: jax.Array   # (Kp, 2*Np) per-N-tile interleaved [value | gate]
    b_merged: jax.Array   # (1, 2*Np)  same interleaving
    dim_in: int
    dim_out: int
    Kp: int
    Np: int
    tn: int
    tk: int


def prepare_geglu_params(w, b, *, tn=512, max_tk=2048):
    """Pad / split / interleave the projection parameters ONCE at init time.

    w: (dim_in, 2*dim_out)  (i.e. torch `proj.weight.T`)
    b: (2*dim_out,) or (1, 2*dim_out)
    """
    K, N2 = w.shape
    dim_out = N2 // 2

    Np = _round_up(dim_out, 128)
    tn = _pick_tile(Np, _round_up(tn, 128))
    nj = Np // tn

    Kp = _round_up(K, 128)
    tk = Kp if Kp <= max_tk else _pick_tile(Kp, _round_up(max_tk, 128))

    w_h, w_g = w[:, :dim_out], w[:, dim_out:]
    b2 = jnp.reshape(b, (1, N2))
    b_h, b_g = b2[:, :dim_out], b2[:, dim_out:]

    # Interleave per N-tile: columns [j*2*tn : j*2*tn+tn] = value, next tn = gate.
    whp = _pad2(w_h, Kp, Np).reshape(Kp, nj, 1, tn)
    wgp = _pad2(w_g, Kp, Np).reshape(Kp, nj, 1, tn)
    w_merged = jnp.concatenate([whp, wgp], axis=2).reshape(Kp, 2 * Np)

    bhp = _pad2(b_h, 1, Np).reshape(1, nj, 1, tn)
    bgp = _pad2(b_g, 1, Np).reshape(1, nj, 1, tn)
    b_merged = jnp.concatenate([bhp, bgp], axis=2).reshape(1, 2 * Np)

    return GegluParams(w_merged, b_merged, K, dim_out, Kp, Np, tn, tk)


def _derived_vmem_limit(tm, tn, tk, x_dtype, w_dtype, out_dtype, n_k):
    bpe = lambda dt: jnp.dtype(dt).itemsize
    x_b = 2 * tm * tk * bpe(x_dtype)            # double-buffered x tile
    w_b = 2 * tk * (2 * tn) * bpe(w_dtype)      # double-buffered merged weight tile
    b_b = 2 * (2 * tn) * bpe(w_dtype)
    o_b = 2 * tm * tn * bpe(out_dtype)
    acc_b = (tm * 2 * tn * 4) if n_k > 1 else 0
    total = x_b + w_b + b_b + o_b + acc_b
    return int(min(max(int(total * 1.5) + (2 << 20), 8 << 20), 48 << 20))


# ----------------------------------------------------------------------------- wrapper


def geglu(x_2d, params: GegluParams, *, tm=512, approximate_gelu=False,
          vmem_limit_bytes=None):
    """x_2d: (M, dim_in) -> (M, dim_out)."""
    M, K = x_2d.shape
    assert K == params.dim_in, (K, params.dim_in)
    Kp, Np, tn, tk = params.Kp, params.Np, params.tn, params.tk
    out_dtype = x_2d.dtype

    tm = min(_round_up(tm, 8), _round_up(M, 8))
    Mp = _round_up(M, tm)

    # Keep both TensorCores of a v7x busy: never collapse the parallel grid to 1x1.
    if Mp // tm == 1 and Np // tn == 1 and M >= 16:
        tm = _round_up((M + 1) // 2, 8)
        Mp = _round_up(M, tm)

    grid_m, grid_n, n_k = Mp // tm, Np // tn, Kp // tk

    xp = _pad2(x_2d, Mp, Kp)                  # no-op if already tile-aligned

    if vmem_limit_bytes is None:
        vmem_limit_bytes = _derived_vmem_limit(
            tm, tn, tk, xp.dtype, params.w_merged.dtype, out_dtype, n_k)

    if n_k == 1:
        kernel = _make_single_k_kernel(tn, approximate_gelu)
        grid = (grid_m, grid_n)
        in_specs = [
            pl.BlockSpec((tm, Kp), lambda i, j: (i, 0)),        # x row tile (whole K)
            pl.BlockSpec((Kp, 2 * tn), lambda i, j: (0, j)),    # merged weight tile
            pl.BlockSpec((1, 2 * tn), lambda i, j: (0, j)),     # merged bias tile
        ]
        out_specs = pl.BlockSpec((tm, tn), lambda i, j: (i, j))
        scratch_shapes = []
        dim_sem = ("parallel", "parallel")
    else:
        kernel = _make_multi_k_kernel(tn, approximate_gelu)
        grid = (grid_m, grid_n, n_k)
        in_specs = [
            pl.BlockSpec((tm, tk), lambda i, j, k: (i, k)),
            pl.BlockSpec((tk, 2 * tn), lambda i, j, k: (k, j)),
            pl.BlockSpec((1, 2 * tn), lambda i, j, k: (0, j)),
        ]
        out_specs = pl.BlockSpec((tm, tn), lambda i, j, k: (i, j))
        scratch_shapes = [pltpu.VMEM((tm, 2 * tn), jnp.float32)]
        dim_sem = ("parallel", "parallel", "arbitrary")

    out_padded = pl.pallas_call(
        kernel,
        out_shape=jax.ShapeDtypeStruct((Mp, Np), out_dtype),
        grid_spec=pltpu.PrefetchScalarGridSpec(
            num_scalar_prefetch=0,
            grid=grid,
            in_specs=in_specs,
            out_specs=out_specs,
            scratch_shapes=scratch_shapes,
        ),
        compiler_params=pltpu.CompilerParams(
            dimension_semantics=dim_sem,
            vmem_limit_bytes=vmem_limit_bytes,
        ),
    )(xp, params.w_merged, params.b_merged)

    if Mp == M and Np == params.dim_out:
        return out_padded
    return out_padded[:M, :params.dim_out]


def geglu_module(x, params: GegluParams, **kwargs):
    """x: (B, S, dim_in) -> (B, S, dim_out)."""
    B, S, K = x.shape
    out_2d = geglu(x.reshape(B * S, K), params, **kwargs)
    return out_2d.reshape(B, S, params.dim_out)


# ----------------------------------------------------------------------------- tests


def _reference(x, w, b):
    proj = jnp.dot(x.astype(jnp.float32), w.astype(jnp.float32),
                   precision=jax.lax.Precision.HIGHEST) + b.reshape(-1).astype(jnp.float32)
    d = proj.shape[-1] // 2
    h, g = proj[..., :d], proj[..., d:]
    return h * (0.5 * g * (1.0 + jax.lax.erf(g * jnp.float32(_INV_SQRT2))))


if __name__ == "__main__":
    key = jax.random.PRNGKey(0)

    # ---- Test 1: small shapes implied by the module (f32, exact erf GELU) ----
    B, S, dim_in, dim_out = 2, 8, 32, 32
    kx, kw, kb = jax.random.split(key, 3)
    x = jax.random.normal(kx, (B, S, dim_in), dtype=jnp.float32)
    w = jax.random.normal(kw, (dim_in, 2 * dim_out), dtype=jnp.float32) * (1.0 / jnp.sqrt(dim_in))
    b = jax.random.normal(kb, (1, 2 * dim_out), dtype=jnp.float32) * 0.01

    params = prepare_geglu_params(w, b)          # done ONCE, not per call
    out = jax.block_until_ready(geglu_module(x, params))
    ref = _reference(x, w, b)
    assert out.shape == (B, S, dim_out)
    assert jnp.allclose(out, ref, atol=1e-5, rtol=1e-5)

    # ---- Test 2: non-aligned M / K / N exercise the padding path (f32) ----
    B2, S2, K2, D2 = 2, 13, 96, 80
    k1, k2, k3 = jax.random.split(jax.random.PRNGKey(1), 3)
    x2 = jax.random.normal(k1, (B2, S2, K2), dtype=jnp.float32)
    w2 = jax.random.normal(k2, (K2, 2 * D2), dtype=jnp.float32) * (1.0 / jnp.sqrt(K2))
    b2 = jax.random.normal(k3, (1, 2 * D2), dtype=jnp.float32) * 0.01
    params2 = prepare_geglu_params(w2, b2)
    out2 = jax.block_until_ready(geglu_module(x2, params2))
    ref2 = _reference(x2, w2, b2)
    assert out2.shape == (B2, S2, D2)
    assert jnp.allclose(out2, ref2, atol=1e-5, rtol=1e-5)

    # ---- Test 3: bf16 operands (full-rate MXU path), f32 accumulation ----
    xb, wb, bb = x.astype(jnp.bfloat16), w.astype(jnp.bfloat16), b.astype(jnp.bfloat16)
    params3 = prepare_geglu_params(wb, bb)
    out3 = jax.block_until_ready(geglu_module(xb, params3))
    ref3 = _reference(xb, wb, bb)
    assert out3.shape == (B, S, dim_out)
    assert jnp.allclose(out3.astype(jnp.float32), ref3, atol=2e-2, rtol=2e-2)

    # ---- Test 4: force the multi-K (reduction-axis) path with max_tk=128 ----
    B4, S4, K4, D4 = 2, 8, 256, 128
    k4, k5, k6 = jax.random.split(jax.random.PRNGKey(2), 3)
    x4 = jax.random.normal(k4, (B4, S4, K4), dtype=jnp.float32)
    w4 = jax.random.normal(k5, (K4, 2 * D4), dtype=jnp.float32) * (1.0 / jnp.sqrt(K4))
    b4 = jax.random.normal(k6, (1, 2 * D4), dtype=jnp.float32) * 0.01
    params4 = prepare_geglu_params(w4, b4, max_tk=128)
    assert params4.Kp // params4.tk > 1          # really exercises the k grid axis
    out4 = jax.block_until_ready(geglu_module(x4, params4))
    ref4 = _reference(x4, w4, b4)
    assert out4.shape == (B4, S4, D4)
    assert jnp.allclose(out4, ref4, atol=1e-5, rtol=1e-5)

    print("KERNEL_OK")
</pallas_src>

<mosaic_0001>
module attributes {stable_mosaic.version = 11 : i64} {
  func.func @kernel(%arg0: i32, %arg1: i32, %arg2: memref<8x128xf32, #tpu.memory_space<vmem>>, %arg3: memref<128x256xf32, #tpu.memory_space<vmem>>, %arg4: memref<1x256xf32, #tpu.memory_space<vmem>>, %arg5: memref<8x128xf32, #tpu.memory_space<vmem>>) attributes {dimension_semantics = [#tpu.dimension_semantics<parallel>, #tpu.dimension_semantics<parallel>], iteration_bounds = array<i64: 2, 1>, scalar_prefetch = 0 : i64, scratch_operands = 0 : i64, tpu.core_type = #tpu.core_type<tc>, window_params = [{transform_indices = @transform_0, window_bounds = array<i64: 8, 128>}, {transform_indices = @transform_1, window_bounds = array<i64: 128, 256>}, {transform_indices = @transform_2, window_bounds = array<i64: 1, 256>}, {transform_indices = @transform_3, window_bounds = array<i64: 8, 128>}]} {
    %c0 = arith.constant 0 : index
    %c0_0 = arith.constant 0 : index
    %0 = vector.load %arg2[%c0, %c0_0] : memref<8x128xf32, #tpu.memory_space<vmem>>, vector<8x128xf32>
    %c0_1 = arith.constant 0 : index
    %c0_2 = arith.constant 0 : index
    %1 = vector.load %arg3[%c0_1, %c0_2] : memref<128x256xf32, #tpu.memory_space<vmem>>, vector<128x256xf32>
    %cst = arith.constant dense<0.000000e+00> : vector<8x256xf32>
    %2 = tpu.matmul %0, %1, %cst {dimension_numbers = #tpu.dot_dimension_numbers<[1], [0], [0], [1], [0, 0, 1, 1], [], []>} : vector<8x128xf32>, vector<128x256xf32>, vector<8x256xf32> -> vector<8x256xf32>
    %c0_3 = arith.constant 0 : index
    %c0_4 = arith.constant 0 : index
    %3 = vector.load %arg4[%c0_3, %c0_4] : memref<1x256xf32, #tpu.memory_space<vmem>>, vector<1x256xf32>
    %4 = vector.broadcast %3 : vector<1x256xf32> to vector<8x256xf32>
    %5 = arith.addf %2, %4 : vector<8x256xf32>
    %6 = vector.extract_strided_slice %5 {offsets = [0, 0], sizes = [8, 128], strides = [1, 1]} : vector<8x256xf32> to vector<8x128xf32>
    %7 = vector.extract_strided_slice %5 {offsets = [0, 128], sizes = [8, 128], strides = [1, 1]} : vector<8x256xf32> to vector<8x128xf32>
    %cst_5 = arith.constant 5.000000e-01 : f32
    %8 = vector.broadcast %cst_5 : f32 to vector<8x128xf32>
    %9 = arith.mulf %8, %7 : vector<8x128xf32>
    %cst_6 = arith.constant 0.707106769 : f32
    %10 = vector.broadcast %cst_6 : f32 to vector<8x128xf32>
    %11 = arith.mulf %7, %10 : vector<8x128xf32>
    %12 = math.erf %11 : vector<8x128xf32>
    %cst_7 = arith.constant 1.000000e+00 : f32
    %13 = vector.broadcast %cst_7 : f32 to vector<8x128xf32>
    %14 = arith.addf %13, %12 : vector<8x128xf32>
    %15 = arith.mulf %9, %14 : vector<8x128xf32>
    %16 = arith.mulf %6, %15 : vector<8x128xf32>
    %c0_8 = arith.constant 0 : index
    %c0_9 = arith.constant 0 : index
    %17 = vector.load %arg5[%c0_8, %c0_9] : memref<8x128xf32, #tpu.memory_space<vmem>>, vector<8x128xf32>
    tpu.vector_store %arg5[%c0_8, %c0_9], %16 {strides = array<i32>} : memref<8x128xf32, #tpu.memory_space<vmem>>, vector<8x128xf32>,
    return
  }
  func.func @transform_0(%arg0: i32, %arg1: i32) -> (i32, i32) {
    %c0_i32 = arith.constant 0 : i32
    %c0_i32_0 = arith.constant 0 : i32
    return %arg0, %c0_i32 : i32, i32
  }
  func.func @transform_1(%arg0: i32, %arg1: i32) -> (i32, i32) {
    %c0_i32 = arith.constant 0 : i32
    %c0_i32_0 = arith.constant 0 : i32
    return %c0_i32, %arg1 : i32, i32
  }
  func.func @transform_2(%arg0: i32, %arg1: i32) -> (i32, i32) {
    %c0_i32 = arith.constant 0 : i32
    %c0_i32_0 = arith.constant 0 : i32
    return %c0_i32, %arg1 : i32, i32
  }
  func.func @transform_3(%arg0: i32, %arg1: i32) -> (i32, i32) {
    %c0_i32 = arith.constant 0 : i32
    return %arg0, %arg1 : i32, i32
  }
}

</mosaic_0001>

<bundles_post_ra>
// kernel: tpu_custom_call.1
= control target key start
LH: loop header
LB: loop body
LE: loop exit
PB: predicated region body
PF: predicated region fallthrough
CT: control target
= control target key end

     0   :  { %8 = vsyncpa [#allocation3], 0  ;;  %s1006_s0 = inlined_call_operand.hbm [shape: f32[16,128], index: 0, kind: input, shape index: {}]   ;;  %s1007_s1 = inlined_call_operand.hbm [shape: f32[128,256], index: 1, kind: input, shape index: {}]   ;;  %s1008_s2 = inlined_call_operand.vmem [shape: f32[1,256], index: 2, kind: input, shape index: {}]   ;;  %s1009_s3 = inlined_call_operand.hbm [shape: f32[16,128], index: 3, kind: output, shape index: {}]  }
   0x1   :  { %10 = vsyncpa [#allocation3 + $0x1], 0 }
   0x2   :  { %11 = vsyncpa [#allocation6], 0 }
   0x3   :  { %12 = vsyncpa [#allocation4], 0 }
   0x4   :  { %14 = vsyncpa [#allocation4 + $0x1], 0  ;;  %s782_s12 = smov 0   ;;  %s784_s13 = smov 0  }
   0x5   :  { %s786_s14 = smov 0   ;;  %s788_s15 = smov 0  }
   0x6   :  { %s790_s16 = smov 0   ;;  %s792_s17 = smov 0  }
   0x7 LB: > { %s484_s18 = sadd.s32 4294967295, %s754_s17   ;;  %s485_s19 = sadd.s32 4294967294, %s754_s17   ;;  %s754_s17 = sphi %s792_s17, %s20_s17   ;;  %s750_s16 = sphi %s790_s16, %s1033_s16   ;;  %s746_s15 = sphi %s788_s15, %s1032_s15   ;;  %s742_s14 = sphi %s786_s14, %s1031_s14   ;;  %s738_s13 = sphi %s784_s13, %s1030_s13   ;;  %s734_s12 = sphi %s782_s12, %s1029_s12  }
   0x8   : > { %p52_p0 = scmp.ne.s32.totalorder %s738_s13, %s734_s12  ;;  %p816_p1 = scmp.eq.s32.totalorder %s484_s18, 0 }
   0x9   : > { %p820_p2 = scmp.eq.s32.totalorder %s484_s18, 1  ;;  %p136_p3 = scmp.eq.s32.totalorder %s485_s19, 1 }
   0xa   : > { %s1014_s20 = scalar_select %p816_p1, 1, 0 }
   0xb   : > { %s1015_s21 = scalar_select %p820_p2, 1, 0 }
   0xc   : > { %p826_p4 = por %p816_p1, %p52_p0  ;;  %p486_p5 = scmp.ge.s32.totalorder %s754_s17, 1 }
   0xd   : > { %p831_p6 = por %p136_p3, %p52_p0  ;;  %p143_p7 = scmp.lt.s32.totalorder %s754_s17, 3 }
   0xe   : > { %s1016_s22 = scalar_select %p826_p4, 1, 0 }
   0xf   : > { %s1017_s23 = scalar_select %p831_p6, 1, 0 }
  0x10   : > { %p836_p8 = pnand %p486_p5, %p143_p7  ;;  %s756_s25 = smov [#allocation5]  }
  0x11   : > { %s158_s26 = sshll.u32 %s756_s25, 4  ;;  %s32_s28 = sadd.s32 1, %s750_s16  ;;  %s159_s26 = int_to_ptr.vmem [resolvable:$true] %s158_s26 }
  0x12   : > { %s1018_s24 = scalar_select %p836_p8, 1, 0 }
  0x13   : > { %p540_p9 = pneg %p836_p8  ;;  %s610_s4 = scalar_lea.hbm %s1007_s1, 4096 }
  0x14   : > { %p611_p12 = scmp.ne.s32.totalorder %s1007_s1, %s610_s4  ;;  %p617_p5 = scmp.lt.u32.totalorder %s610_s4, %s1007_s1 }
  0x15   : > { %p845_p11 = pnand %p540_p9, %p816_p1 }
  0x17   : > { %p612_p13 = pneg %p845_p11 }
  0x19   : > { %p613_p0 = pnand %p612_p13, %p611_p12 }
  0x1b   : > { %p614_p3 = pneg %p613_p0 }
  0x1d   : > { %p619_p7 = pnand %p617_p5, %p614_p3 }
  0x1f   : > { %622 = shalt.err (!%p619_p7)
}
  0x20   : > { %s623_s9 = scalar_lea.vmem %s159_s26, 4096  ;;  %p631_p1 = scmp.lt.s32.totalorder %s159_s26, %s159_s26 }
  0x21   : > { %p624_p9 = scmp.ne.s32.totalorder %s159_s26, %s623_s9  ;;  %p632_p4 = scmp.lt.s32.totalorder %s623_s9, %s623_s9 }
  0x23   : > { %p626_p10 = pnand %p624_p9, %p612_p13  ;;  %p633_p8 = por %p632_p4, %p631_p1 }
  0x25   : > { %p627_p6 = pneg %p626_p10 }
  0x27   : > { %p634_p2 = pnand %p633_p8, %p627_p6 }
  0x29   : > { %637 = shalt.err (!%p634_p2)
}
  0x2a   : > { %s757_s10 = smov 256   ;;  %s758_s11 = smov 16  }
  0x2b   : > { %543 = dma.hbm_to_vmem [thread:$0]  (!%p845_p11), %s1007_s1, 4096, %s159_s26, [#allocation6], %s757_s10, %s757_s10, %s758_s11  }
  0x2c   : > { %p34_p1 = scmp.ge.s32.totalorder %s32_s28, 2  ;;  %s39_s25 = sadd.s32 1, %s742_s14 }
  0x2d   : > { %p46_p2 = scmp.ne.s32.totalorder %s742_s14, %s738_s13  ;;  %p47_p4 = scmp.eq.s32.totalorder %s754_s17, 0 }
  0x2e   : > { %s1035_s28 = smov (%p34_p1, %s32_s28), 0  ;;  %p1021_p8 = scmp.ne.s32.totalorder %s1015_s21, 0 }
  0x2f   : > { %p872_p6 = por %p47_p4, %p46_p2  ;;  %s36_s27 = ssub.s32 %s750_s16, %s1035_s28 }
  0x30   : > { %p878_p10 = por %p1021_p8, %p46_p2  ;;  %p553_p12 = scmp.lt.s32.totalorder %s754_s17, 2 }
  0x31   : > { %p37_p11 = scmp.eq.s32.totalorder %s36_s27, 0  ;;  %s180_s26 = sand.u32 1, %s742_s14  }
  0x32   : > { %s490_s4 = sshll.u32 %s180_s26, 3  ;;  %s491_s6 = sshll.u32 %s750_s16, 7 }
  0x33   : > { %s887_s5 = scalar_select %p37_p11, %s742_s14, %s39_s25  }
  0x34   : > { %s893_s9 = scalar_lea.hbm %s1006_s0, %s491_s6  ;;  %s184_s21 = scalar_lea.vmem [#allocation2], %s490_s4 }
  0x35   : > { %s191_s10 = sshll.u32 %s184_s21, 4  ;;  %p899_p13 = pnand %p553_p12, %p872_p6  ;;  %s895_s10 = int_to_ptr.vmem [resolvable:$true] %s191_s10 }
  0x36   : > { %s181_s18 = scalar_lea.sflag [#allocation3], %s180_s26  ;;  %s638_s19 = scalar_lea.hbm %s893_s9, 128 }
  0x37   : > { %p639_p0 = scmp.ne.s32.totalorder %s893_s9, %s638_s19  ;;  %p640_p3 = pneg %p899_p13 }
  0x38   : > { %s643_s4 = scalar_lea.hbm %s1006_s0, 256  ;;  %p644_p9 = scmp.lt.u32.totalorder %s893_s9, %s1006_s0 }
  0x39   : > { %p641_p5 = pnand %p640_p3, %p639_p0  ;;  %p645_p1 = scmp.lt.u32.totalorder %s643_s4, %s638_s19 }
  0x3a   : > { %p647_p4 = scmp.lt.u32.totalorder %s638_s19, %s893_s9 }
  0x3b   : > { %p642_p7 = pneg %p641_p5  ;;  %p646_p2 = por %p645_p1, %p644_p9 }
  0x3d   : > { %p648_p6 = por %p647_p4, %p646_p2 }
  0x3f   : > { %p649_p8 = pnand %p648_p6, %p642_p7 }
  0x41   : > { %652 = shalt.err (!%p649_p8)
}
  0x42   : > { %s653_s26 = scalar_lea.vmem %s895_s10, 128  ;;  %s759_s7 = smov [#allocation2]  }
  0x43   : > { %p654_p12 = scmp.ne.s32.totalorder %s895_s10, %s653_s26  ;;  %s658_s8 = sshll.u32 %s759_s7, 4  ;;  %s659_s8 = int_to_ptr.vmem [resolvable:$false] %s658_s8 }
  0x44   : > { %s660_s21 = scalar_lea.vmem %s659_s8, 256  ;;  %p661_p5 = scmp.lt.s32.totalorder %s895_s10, %s659_s8 }
  0x45   : > { %p656_p11 = pnand %p654_p12, %p640_p3  ;;  %p662_p9 = scmp.lt.s32.totalorder %s660_s21, %s653_s26 }
  0x47   : > { %p657_p0 = pneg %p656_p11  ;;  %p663_p1 = por %p662_p9, %p661_p5 }
  0x49   : > { %p664_p2 = pnand %p663_p1, %p657_p0 }
  0x4b   : > { %667 = shalt.err (!%p664_p2)
}
  0x4c   : > { %547 = dma.hbm_to_vmem [thread:$0]  (!%p899_p13), %s893_s9, 128, %s895_s10, %s181_s18  }
  0x4d   : > { %p1024_p7 = scmp.ne.s32.totalorder %s1018_s24, 0 }
  0x4e   : > { %s931_s19 = sand.u32 (!%p1024_p7), 1, %s738_s13   ;;  %p1025_p3 = scmp.ne.s32.totalorder (!%p1024_p7), %s1016_s22, 0 }
  0x4f   : > { %200 = sbr.rel (%p1024_p7) target bundleno = 373 (0x175), region = 32  ;;  %s493_s25 = sshll.u32 (!%p1024_p7), %s931_s19, 3 }
  0x50   : > { %s203_s27 = scalar_lea.sflag (!%p1024_p7), [#allocation3], %s931_s19  ;;  %s937_s4 = scalar_lea.vmem (!%p1024_p7), [#allocation2], %s493_s25 }
  0x56   : > { %721 = dma.done.wait (%p1025_p3), %s203_s27, 128  }
  0x57   : > { %723 = vsyncadd (%p1025_p3), %s203_s27, 4294967168  ;;  %p1026_p13 = scmp.ne.s32.totalorder %s1014_s20, 0 }
  0x59   : > { %725 = dma.done.wait (%p1026_p13), [#allocation6], 4096  }
  0x5a   : > { %727 = vsyncadd (%p1026_p13), [#allocation6], 4294963200  ;;  %v760_v0 = vmov 0.0   ;;  %v245_v1 = vld [vmem:[#allocation5 + $0x8] sm:$0xff]  ;;  %v247_v2 = vld [vmem:[#allocation5 + $0x18] sm:$0xff]  ;;  %v278_v50 = vlaneseq  ;;  %s497_s24 = sshll.u32 %s746_s15, 7 }
  0x5b   : > { %352 = vmatprep.mubr.f32.mxu0 %v760_v0  ;;  %v244_v3 = vld [vmem:[#allocation5] sm:$0xff]  ;;  %v500_v4 = vpack.c.bf16 %v247_v2, %v245_v1  ;;  %v246_v5 = vld [vmem:[#allocation5 + $0x10] sm:$0xff]  ;;  %v249_v6 = vld [vmem:[#allocation5 + $0x28] sm:$0xff]  ;;  %s236_s9 = scalar_lea.vmem [#allocation7], %s493_s25  ;;  %s957_s29 = scalar_lea.hbm %s1009_s3, %s497_s24 }
  0x5c   : > { %v251_v7 = vld [vmem:[#allocation5 + $0x38] sm:$0xff]  ;;  %v502_v8 = vpack.c.bf16 %v246_v5, %v244_v3  ;;  %v248_v10 = vld [vmem:[#allocation5 + $0x20] sm:$0xff]  ;;  %v250_v11 = vld [vmem:[#allocation5 + $0x30] sm:$0xff]  ;;  %v279_v51 = vshrl.u32 %v278_v50, 7  ;;  %s381_s10 = sshll.u32 %s236_s9, 4  ;;  %s367_s6 = scalar_lea.sflag [#allocation4], %s931_s19  ;;  %s959_s10 = int_to_ptr.vmem [resolvable:$true] %s381_s10 }
  0x5d   : > { %v504_v9 = vpack.c.bf16 %v251_v7, %v249_v6  ;;  %v253_v12 = vld [vmem:[#allocation5 + $0x48] sm:$0xff]  ;;  %501 = vmatprep.subr.bf16.mxu0 %v500_v4  ;;  %v255_v13 = vld [vmem:[#allocation5 + $0x58] sm:$0xff]  ;;  %v506_v14 = vpack.c.bf16 %v250_v11, %v248_v10  ;;  %v252_v16 = vld [vmem:[#allocation5 + $0x40] sm:$0xff]  ;;  %s668_s26 = scalar_lea.vmem %s959_s10, 128  ;;  %s761_s15 = smov [#allocation7]  }
  0x5e   : > { %503 = vmatpush1.bf16.msra.mxu0 %v502_v8  ;;  %v508_v15 = vpack.c.bf16 %v255_v13, %v253_v12  ;;  %v254_v17 = vld [vmem:[#allocation5 + $0x50] sm:$0xff]  ;;  %v257_v18 = vld [vmem:[#allocation5 + $0x68] sm:$0xff]  ;;  %v259_v19 = vld [vmem:[#allocation5 + $0x78] sm:$0xff]  ;;  %v284_v52 = vsub.s32 1, %v279_v51  ;;  %v280_v59 = vsub.s32 0, %v279_v51  ;;  %p669_p4 = scmp.ne.s32.totalorder %s959_s10, %s668_s26  ;;  %s672_s7 = sshll.u32 %s761_s15, 4  ;;  %s673_s7 = int_to_ptr.vmem [resolvable:$false] %s672_s7 }
  0x5f   : > { %505 = vmatprep.subr.bf16.mxu0 %v504_v9  ;;  %v510_v20 = vpack.c.bf16 %v254_v17, %v252_v16  ;;  %v512_v21 = vpack.c.bf16 %v259_v19, %v257_v18  ;;  %v256_v22 = vld [vmem:[#allocation5 + $0x60] sm:$0xff]  ;;  %v258_v23 = vld [vmem:[#allocation5 + $0x70] sm:$0xff]  ;;  %v261_v24 = vld [vmem:[#allocation5 + $0x88] sm:$0xff]  ;;  %s674_s8 = scalar_lea.vmem %s673_s7, 256  ;;  %p675_p12 = scmp.lt.s32.totalorder %s959_s10, %s673_s7 }
  0x60   : > { %v263_v25 = vld [vmem:[#allocation5 + $0x98] sm:$0xff]  ;;  %v514_v26 = vpack.c.bf16 %v258_v23, %v256_v22  ;;  %v260_v28 = vld [vmem:[#allocation5 + $0x80] sm:$0xff]  ;;  %v262_v29 = vld [vmem:[#allocation5 + $0x90] sm:$0xff]  ;;  %p670_p6 = pnand %p669_p4, %p878_p10  ;;  %p676_p11 = scmp.lt.s32.totalorder %s674_s8, %s668_s26 }
  0x61   : > { %v516_v27 = vpack.c.bf16 %v263_v25, %v261_v24  ;;  %v265_v30 = vld [vmem:[#allocation5 + $0xa8] sm:$0xff]  ;;  %v267_v31 = vld [vmem:[#allocation5 + $0xb8] sm:$0xff]  ;;  %v518_v32 = vpack.c.bf16 %v262_v29, %v260_v28  ;;  %v264_v34 = vld [vmem:[#allocation5 + $0xa0] sm:$0xff] }
  0x62   : > { %507 = vmatpush1.bf16.msra.mxu0 %v506_v14  ;;  %v520_v33 = vpack.c.bf16 %v267_v31, %v265_v30  ;;  %v266_v35 = vld [vmem:[#allocation5 + $0xb0] sm:$0xff]  ;;  %v269_v36 = vld [vmem:[#allocation5 + $0xc8] sm:$0xff]  ;;  %v271_v37 = vld [vmem:[#allocation5 + $0xd8] sm:$0xff]  ;;  %p671_p8 = pneg %p670_p6  ;;  %p677_p0 = por %p676_p11, %p675_p12 }
  0x63   : > { %509 = vmatprep.subr.bf16.mxu0 %v508_v15  ;;  %v522_v38 = vpack.c.bf16 %v266_v35, %v264_v34  ;;  %v524_v39 = vpack.c.bf16 %v271_v37, %v269_v36  ;;  %v268_v40 = vld [vmem:[#allocation5 + $0xc0] sm:$0xff]  ;;  %v270_v41 = vld [vmem:[#allocation5 + $0xd0] sm:$0xff]  ;;  %v273_v42 = vld [vmem:[#allocation5 + $0xe8] sm:$0xff] }
  0x64   : > { %v275_v43 = vld [vmem:[#allocation5 + $0xf8] sm:$0xff]  ;;  %v526_v44 = vpack.c.bf16 %v270_v41, %v268_v40  ;;  %v272_v46 = vld [vmem:[#allocation5 + $0xe0] sm:$0xff]  ;;  %v274_v47 = vld [vmem:[#allocation5 + $0xf0] sm:$0xff]  ;;  %p678_p5 = pnand %p677_p0, %p671_p8 }
  0x65   : > { %v528_v45 = vpack.c.bf16 %v275_v43, %v273_v42  ;;  %v530_v48 = vpack.c.bf16 %v274_v47, %v272_v46  ;;  %v243_v49 = vld [vmem:[%s937_s4] sm:$0xff] }
  0x66   : > { %511 = vmatpush1.bf16.msra.mxu0 %v510_v20  ;;  %v276_v53 = vld [vmem:[%s1008_s2] sm:$0x3] }
  0x67   : > { %513 = vmatprep.subr.bf16.mxu0 %v512_v21  ;;  %v285_v54 = vrot.slane %v276_v53, %v284_v52  ;;  %v281_v60 = vrot.slane %v276_v53, %v280_v59 }
  0x6a   : > { %515 = vmatpush1.bf16.msra.mxu0 %v514_v26 }
  0x6b   : > { %517 = vmatprep.subr.bf16.mxu0 %v516_v27 }
  0x6e   : > { %519 = vmatpush1.bf16.msra.mxu0 %v518_v32 }
  0x6f   : > { %521 = vmatprep.subr.bf16.mxu0 %v520_v33 }
  0x72   : > { %523 = vmatpush1.bf16.msra.mxu0 %v522_v38 }
  0x73   : > { %525 = vmatprep.subr.bf16.mxu0 %v524_v39 }
  0x76   : > { %527 = vmatpush1.bf16.msra.mxu0 %v526_v44 }
  0x77   : > { %529 = vmatprep.subr.bf16.mxu0 %v528_v45 }
  0x7a   : > { %531 = vmatpush1.bf16.msra.mxu0 %v530_v48 }
  0x7d   : > { %353 = vmatmul.mubr.f32.vlgmr.msra.gmra.mrb[0].mxu0 %v243_v49 }
 0x150   : > { %v354_v55 = vpop.f32.mrb[0].mxu0 }
 0x151   : > { %v356_v56 = vpop.f32.mrb[1].mxu0  ;;  %v355_v0 = vadd.f32 %v354_v55, %v281_v60 }
 0x152   : > { %v357_v57 = vadd.f32 %v356_v56, %v285_v54 }
 0x154   : > { %v360_v58 = vmul.f32 0.70710677, %v357_v57  ;;  %v359_v62 = vmul.f32 0.5, %v357_v57 }
 0x156   : > { %608 = verf.f32 %v360_v58 }
 0x160   : > { %v609_v61 = vpop.eup %608 }
 0x161   : > { %v362_v63 = vadd.f32 1.0, %v609_v61 }
 0x163   : > { %v363_v1 = vmul.f32 %v362_v63, %v359_v62 }
 0x165   : > { %v364_v2 = vmul.f32 %v363_v1, %v355_v0 }
 0x167   : > { %365 = vst [vmem:[%s236_s9] sm:$0xff] %v364_v2 }
 0x168   : > { %681 = shalt.err (!%p678_p5)
}
 0x169   : > { %s682_s21 = scalar_lea.hbm %s957_s29, 128  ;;  %s686_s27 = scalar_lea.hbm %s1009_s3, 256 }
 0x16a   : > { %p683_p9 = scmp.ne.s32.totalorder %s957_s29, %s682_s21  ;;  %p687_p7 = scmp.lt.u32.totalorder %s957_s29, %s1009_s3 }
 0x16b   : > { %p688_p3 = scmp.lt.u32.totalorder %s686_s27, %s682_s21  ;;  %p690_p4 = scmp.lt.u32.totalorder %s682_s21, %s957_s29 }
 0x16c   : > { %p684_p1 = pnand %p683_p9, %p878_p10 }
 0x16d   : > { %p689_p13 = por %p688_p3, %p687_p7 }
 0x16e   : > { %p685_p2 = pneg %p684_p1 }
 0x16f   : > { %p691_p6 = por %p690_p4, %p689_p13 }
 0x171   : > { %p692_p8 = pnand %p691_p6, %p685_p2 }
 0x173   : > { %695 = shalt.err (!%p692_p8)
}
 0x174   : > { %538 = dma.vmem_to_hbm [thread:$0]  (%p878_p10), %s959_s10, 128, %s957_s29, %s367_s6  }
 0x175 PF: > { %s393_s22 = sand.u32 1, %s734_s12   ;;  %p1027_p12 = scmp.ne.s32.totalorder %s1017_s23, 0 }
 0x176   : > { %p1028_p11 = scmp.ge.s32.totalorder %s754_s17, 2  ;;  %s394_s24 = scalar_lea.sflag [#allocation4], %s393_s22 }
 0x178   : > { %p549_p0 = pnand %p1028_p11, %p1027_p12 }
 0x17a   : > { %729 = dma.done.wait (!%p549_p0), %s394_s24, 128  }
 0x17b   : > { %731 = vsyncadd (!%p549_p0), %s394_s24, 4294967168  ;;  %s20_s17 = sadd.s32 1, %s754_s17   ;;  %s1029_s12 = smov %s738_s13 }
 0x17c   : > { %p17_p5 = scmp.ge.s32.totalorder %s20_s17, 4   ;;  %s1030_s13 = smov %s742_s14 }
 0x17d   : > { %s1031_s14 = smov %s887_s5  ;;  %s1032_s15 = smov %s750_s16 }
 0x17e   : > { %s1033_s16 = smov %s1035_s28  ;;  %19 = sbr.rel (!%p17_p5) target bundleno = 7 (0x7), region = 85 }
 0x185   :  { %399 = vsyncpa [#allocation3], 1 }
 0x186   :  { %401 = vsyncpa [#allocation3 + $0x1], 1 }
 0x187   :  { %402 = vsyncpa [#allocation6], 1 }
 0x188   :  { %403 = vsyncpa [#allocation4], 1 }
 0x189   :  { %405 = vsyncpa [#allocation4 + $0x1], 1 }

</bundles_post_ra>
